<compile_context>
chip_gen: v7x
topology: tpu7x:2x2x1
jax: 0.10.0
libtpu: 0.0.40
codegen_flags: <defaults>
</compile_context>

<pallas_src>
import functools

import jax
import jax.numpy as jnp
import numpy as np
from jax.experimental import pallas as pl
from jax.experimental.pallas import tpu as pltpu

MARGIN = 0.3
MAX_TILE = 64          # DP lane batch per grid step is 2*tile (pos+neg fused) <= 128 lanes
MXU_GROUP_ROWS = 128   # anchor rows per fused MXU pass (~native 128x128 tile; 256 on v6e/v7x)


def _pick_tile(N, m, max_tile=MAX_TILE):
    """Largest tile <= max_tile that divides N and keeps (tile*m) sublane-aligned."""
    t = min(max_tile, N)
    while t > 1 and (N % t or (t * m) % 8):
        t -= 1
    if N % t or ((t * m) % 8 and t != N):
        t = N   # fall back to a single full-batch tile (block == full dims)
    return t
    # TODO(synk): for v7x prefer a tile that makes num_tiles even (>=2) when N allows,
    # so both TensorCores get work under dimension_semantics=("parallel",).


def _normalize_kernel(x_ref, o_ref):
    # x / (||x||_2 + 1e-12) — matches the PyTorch reference epsilon exactly.
    x = x_ref[...].astype(jnp.float32)
    nrm = jnp.sqrt(jnp.sum(x * x, axis=-1, keepdims=True))
    o_ref[...] = x / (nrm + 1e-12)


def _local_dist_kernel(p_ref, n_ref, xg_ref, anc_ref, out_ref, gbuf_ref, *, tile_n, m):
    """One batch tile: gather -> fused MXU -> fused (pos+neg) wavefront DP."""
    B = tile_n
    n = m                        # positives/negatives have the same part count
    K = m + n - 1
    L = 2 * B                    # DP lane batch: lanes [0,B) = pos, [B,2B) = neg
    BIG = jnp.float32(1e9)       # "infinity" pad for invalid DP cells

    # MXU group: G anchors per fused pass so G*m ~= MXU_GROUP_ROWS rows.
    G = min(B, max(1, MXU_GROUP_ROWS // m))
    while B % G:
        G -= 1
    NG = B // G

    t = pl.program_id(0)
    base = t * B

    # ---- 1) Gather positives/negatives straight into VMEM scratch ------------------
    # Group-major layout: group g occupies rows [2*g*G*m, 2*(g+1)*G*m):
    #   first G*m rows = positives of its anchors, next G*m rows = negatives.
    for g in range(NG):
        goff = 2 * g * G * m
        for a in range(G):
            r = base + g * G + a
            ps = pl.multiple_of(p_ref[r] * m, m)
            ns = pl.multiple_of(n_ref[r] * m, m)
            gbuf_ref[pl.ds(goff + a * m, m), :] = xg_ref[pl.ds(ps, m), :]
            gbuf_ref[pl.ds(goff + (G + a) * m, m), :] = xg_ref[pl.ds(ns, m), :]

    # ---- 2) Fused MXU passes + diagonal-block stacking (batch -> lane axis) --------
    anc = anc_ref[...]                                   # [B*m, d], already unit-norm f32
    pos_blocks, neg_blocks = [], []
    for g in range(NG):
        xa = anc[g * G * m:(g + 1) * G * m, :]           # [G*m, d]
        rhs = gbuf_ref[2 * g * G * m:2 * (g + 1) * G * m, :]   # [2*G*m, d]
        # TODO(synk): cast xa/rhs to bfloat16 (keep preferred f32 accum) once validated
        # against the 5e-3 tolerance; saves MXU passes at larger group sizes.
        gm = jax.lax.dot_general(xa, rhs, (((1,), (1,)), ((), ())),
                                 preferred_element_type=jnp.float32)   # [G*m, 2*G*m]
        for a in range(G):
            r0 = a * m
            pos_blocks.append(gm[r0:r0 + m, r0:r0 + m])
            neg_blocks.append(gm[r0:r0 + m, G * m + r0:G * m + r0 + m])
    cross = jnp.stack(pos_blocks + neg_blocks, axis=-1)                # [m, n, L]

    # Rows are unit-norm  =>  ||a-b||^2 = 2 - 2 a.b ;  (e^x-1)/(e^x+1) = tanh(x/2)
    dist = jnp.sqrt(jnp.maximum(2.0 - 2.0 * cross, 1e-12))
    dist = jnp.tanh(0.5 * dist)                                        # [m, n, L]

    # ---- 3) Skew: row i shifted right by i so anti-diagonal k is a column slice ----
    # TODO(synk): a single strided pltpu.roll (axis=1, stride=1, stride_axis=0) into a
    # K-leading [K, m, L] layout would build this in one XLU op; kept as the per-row
    # concat + major-axis stack for Mosaic lowering robustness.
    rows = []
    for i in range(m):
        parts = []
        if i > 0:
            parts.append(jnp.full((i, L), BIG, jnp.float32))
        parts.append(dist[i])                                          # [n, L]
        if m - 1 - i > 0:
            parts.append(jnp.full((m - 1 - i, L), BIG, jnp.float32))
        rows.append(jnp.concatenate(parts, axis=0) if len(parts) > 1 else parts[0])
    S = jnp.stack(rows, axis=0)                                        # [m, K, L]

    # ---- 4) Wavefront DP over anti-diagonals (one fused chain for pos AND neg) -----
    row0 = jax.lax.broadcasted_iota(jnp.int32, (m, L), 0) == 0
    dp = jnp.where(row0, jnp.float32(0.0), BIG)                        # [m, L]
    for k in range(K):
        # shifted[i] = dp[i-1]; row 0 = BIG.  Roll is an XLU op, off the VALU slot.
        shifted = jnp.where(row0, BIG, pltpu.roll(dp, 1, 0))
        dp = jnp.minimum(shifted, dp) + S[:, k, :]
    out_ref[...] = dp[m - 1, :].reshape(1, 1, L)                       # lanes: [dap | dan]


def local_loss_idx_forward(local_feat, p_inds, n_inds, labels=None, margin=MARGIN):
    """local_feat: [N, m, d]; p_inds/n_inds: [N] int indices into the batch."""
    del labels                                  # unused by the PyTorch forward as well
    N, m, d = local_feat.shape
    tile = _pick_tile(N, m)
    num_tiles = N // tile
    L = 2 * tile

    xf = local_feat.reshape(N * m, d)

    # Pre-pass: L2-normalize every row exactly once.
    x_norm = pl.pallas_call(
        _normalize_kernel,
        grid_spec=pltpu.PrefetchScalarGridSpec(
            num_scalar_prefetch=0,
            grid=(num_tiles,),
            in_specs=[pl.BlockSpec((tile * m, d), lambda t: (t, 0))],
            out_specs=pl.BlockSpec((tile * m, d), lambda t: (t, 0)),
        ),
        out_shape=jax.ShapeDtypeStruct((N * m, d), jnp.float32),
        compiler_params=pltpu.CompilerParams(dimension_semantics=("parallel",)),
    )(xf)

    kernel = functools.partial(_local_dist_kernel, tile_n=tile, m=m)
    x_bytes = N * m * d * 4
    vmem_limit = int(min(max(2 * x_bytes + (16 << 20), 32 << 20), 128 << 20))

    grid_spec = pltpu.PrefetchScalarGridSpec(
        num_scalar_prefetch=2,                  # p_inds, n_inds live in SMEM
        grid=(num_tiles,),
        in_specs=[
            # Whole normalized x stays VMEM-resident for the in-kernel gathers
            # (constant block index -> DMA'd from HBM once).
            # TODO(synk): for production N*m*d beyond VMEM (esp. v7x 64 MiB/TC), switch
            # to memory_space=pl.ANY + double-buffered make_async_copy row gathers
            # (and/or pipeline_mode=pl.Buffered(1) to drop the second resident buffer).
            pl.BlockSpec((N * m, d), lambda t, p, n: (0, 0)),
            # Anchor rows of this tile: contiguous, pipelined by Pallas.
            pl.BlockSpec((tile * m, d), lambda t, p, n: (t, 0)),
        ],
        out_specs=pl.BlockSpec((1, 1, L), lambda t, p, n: (t, 0, 0)),
        scratch_shapes=[pltpu.VMEM((2 * tile * m, d), jnp.float32)],
    )
    dists = pl.pallas_call(
        kernel,
        grid_spec=grid_spec,
        out_shape=jax.ShapeDtypeStruct((num_tiles, 1, L), jnp.float32),
        compiler_params=pltpu.CompilerParams(
            dimension_semantics=("parallel",),   # batch tiles shard across TCs (v7x)
            vmem_limit_bytes=vmem_limit,
        ),
    )(p_inds.astype(jnp.int32), n_inds.astype(jnp.int32), x_norm, x_norm)

    per_tile = dists.reshape(num_tiles, 2, tile)
    dist_ap = per_tile[:, 0, :].reshape(N)
    dist_an = per_tile[:, 1, :].reshape(N)
    # MarginRankingLoss(margin)(dist_an, dist_ap, y=1) — tiny cross-tile glue, because
    # the (parallel) grid axis cannot accumulate in-kernel.
    loss = jnp.mean(jnp.maximum(0.0, margin - (dist_an - dist_ap)))
    return loss, dist_ap, dist_an


def _reference(local_feat, p_inds, n_inds, margin=MARGIN):
    """Pure numpy (float64) port of the PyTorch module, for verification."""
    x = np.asarray(local_feat, dtype=np.float64)
    nrm = np.sqrt((x * x).sum(-1, keepdims=True))
    x = x / (nrm + 1e-12)

    def batch_local_dist(a, b):
        aa = (a * a).sum(-1, keepdims=True)
        bb = (b * b).sum(-1, keepdims=True)
        cross = np.einsum("bmd,bnd->bmn", a, b)
        dist = aa + np.transpose(bb, (0, 2, 1)) - 2.0 * cross
        dist = np.sqrt(np.clip(dist, 1e-12, None))
        dist = (np.exp(dist) - 1.0) / (np.exp(dist) + 1.0)
        _, mm, nn = dist.shape
        dp = [[None] * nn for _ in range(mm)]
        for i in range(mm):
            for j in range(nn):
                if i == 0 and j == 0:
                    dp[i][j] = dist[:, i, j]
                elif i == 0:
                    dp[i][j] = dp[i][j - 1] + dist[:, i, j]
                elif j == 0:
                    dp[i][j] = dp[i - 1][j] + dist[:, i, j]
                else:
                    dp[i][j] = np.minimum(dp[i - 1][j], dp[i][j - 1]) + dist[:, i, j]
        return dp[-1][-1]

    pa = batch_local_dist(x, x[np.asarray(p_inds)])
    na = batch_local_dist(x, x[np.asarray(n_inds)])
    loss = np.mean(np.maximum(0.0, margin - (na - pa)))
    return loss, pa, na


if __name__ == "__main__":
    key = jax.random.PRNGKey(0)
    N, m, d = 8, 8, 32  # batch, local parts, feature dim
    local_feat = jax.random.normal(key, (N, m, d), dtype=jnp.float32)
    # hardest-positive / hardest-negative indices (deterministic, no self-pairs)
    p_inds = jnp.roll(jnp.arange(N, dtype=jnp.int32), 1)
    n_inds = jnp.roll(jnp.arange(N, dtype=jnp.int32), 3)
    labels = jnp.arange(N, dtype=jnp.int32)  # unused by the forward

    loss, dist_ap, dist_an = local_loss_idx_forward(local_feat, p_inds, n_inds, labels)
    jax.block_until_ready((loss, dist_ap, dist_an))

    ref_loss, ref_ap, ref_an = _reference(np.asarray(local_feat),
                                          np.asarray(p_inds), np.asarray(n_inds))
    np.testing.assert_allclose(np.asarray(dist_ap), ref_ap, rtol=5e-3, atol=5e-3)
    np.testing.assert_allclose(np.asarray(dist_an), ref_an, rtol=5e-3, atol=5e-3)
    np.testing.assert_allclose(float(loss), float(ref_loss), rtol=5e-3, atol=5e-3)
    print("KERNEL_OK")
</pallas_src>

<mosaic_0001>
module attributes {stable_mosaic.version = 11 : i64} {
  func.func @_normalize_kernel(%arg0: i32, %arg1: memref<64x32xf32, #tpu.memory_space<vmem>>, %arg2: memref<64x32xf32, #tpu.memory_space<vmem>>) attributes {dimension_semantics = [#tpu.dimension_semantics<parallel>], iteration_bounds = array<i64: 1>, scalar_prefetch = 0 : i64, scratch_operands = 0 : i64, tpu.core_type = #tpu.core_type<tc>, window_params = [{transform_indices = @transform_0, window_bounds = array<i64: 64, 32>}, {transform_indices = @transform_1, window_bounds = array<i64: 64, 32>}]} {
    %c0 = arith.constant 0 : index
    %c0_0 = arith.constant 0 : index
    %0 = vector.load %arg1[%c0, %c0_0] : memref<64x32xf32, #tpu.memory_space<vmem>>, vector<64x32xf32>
    %1 = arith.mulf %0, %0 : vector<64x32xf32>
    %cst = arith.constant dense<0.000000e+00> : vector<64xf32>
    %2 = vector.multi_reduction <add>, %1, %cst [1] : vector<64x32xf32> to vector<64xf32>
    %3 = vector.shape_cast %2 : vector<64xf32> to vector<64x1xf32>
    %4 = math.sqrt %3 : vector<64x1xf32>
    %cst_1 = arith.constant 9.99999996E-13 : f32
    %5 = vector.broadcast %cst_1 : f32 to vector<64x1xf32>
    %6 = arith.addf %4, %5 : vector<64x1xf32>
    %7 = vector.broadcast %6 : vector<64x1xf32> to vector<64x32xf32>
    %8 = arith.divf %0, %7 : vector<64x32xf32>
    %c0_2 = arith.constant 0 : index
    %c0_3 = arith.constant 0 : index
    %9 = vector.load %arg2[%c0_2, %c0_3] : memref<64x32xf32, #tpu.memory_space<vmem>>, vector<64x32xf32>
    tpu.vector_store %arg2[%c0_2, %c0_3], %8 {strides = array<i32>} : memref<64x32xf32, #tpu.memory_space<vmem>>, vector<64x32xf32>,
    return
  }
  func.func @transform_0(%arg0: i32) -> (i32, i32) {
    %c0_i32 = arith.constant 0 : i32
    %c0_i32_0 = arith.constant 0 : i32
    return %arg0, %c0_i32 : i32, i32
  }
  func.func @transform_1(%arg0: i32) -> (i32, i32) {
    %c0_i32 = arith.constant 0 : i32
    %c0_i32_0 = arith.constant 0 : i32
    return %arg0, %c0_i32 : i32, i32
  }
}

</mosaic_0001>

<bundles_post_ra>
// kernel: tpu_custom_call.1
= control target key start
LH: loop header
LB: loop body
LE: loop exit
PB: predicated region body
PF: predicated region fallthrough
CT: control target
= control target key end

     0   :  { %vm24_vm0 = vcmask 261120   ;;  %s303_s0 = inlined_call_operand.vmem [shape: f32[64,32], index: 0, kind: input, shape index: {}]   ;;  %s304_s1 = inlined_call_operand.vmem [shape: f32[64,32], index: 1, kind: output, shape index: {}]  }
   0x1   :  { %v186_v0 = vld [vmem:[%s303_s0 + $0x10] sm:$0xff]  ;;  %v191_v1 = vld [vmem:[%s303_s0] sm:$0xff]  ;;  %v196_v2 = vld [vmem:[%s303_s0 + $0x18] sm:$0xff] }
   0x2   :  { %v18_v3 = vmul.f32 %v186_v0, %v186_v0  ;;  %v16_v4 = vmul.f32 %v191_v1, %v191_v1  ;;  %v19_v5 = vmul.f32 %v196_v2, %v196_v2  ;;  %v207_v6 = vld [vmem:[%s303_s0 + $0x8] sm:$0xff]  ;;  %v219_v9 = vld [vmem:[%s303_s0 + $0x20] sm:$0xff]  ;;  %v232_v16 = vld [vmem:[%s303_s0 + $0x38] sm:$0xff] }
   0x3   :  { %v17_v7 = vmul.f32 %v207_v6, %v207_v6  ;;  %v214_v8 = vld [vmem:[%s303_s0 + $0x28] sm:$0xff]  ;;  %v20_v15 = vmul.f32 %v219_v9, %v219_v9  ;;  %v237_v17 = vld [vmem:[%s303_s0 + $0x30] sm:$0xff]  ;;  %v23_v20 = vmul.f32 %v232_v16, %v232_v16 }
   0x4   :  { %v31_v10 = vsel %vm24_vm0, %v18_v3, 0.0  ;;  %v25_v11 = vsel %vm24_vm0, %v16_v4, 0.0  ;;  %v34_v12 = vsel %vm24_vm0, %v19_v5, 0.0  ;;  %v21_v14 = vmul.f32 %v214_v8, %v214_v8 }
   0x5   :  { %32 = vadd.xlane.f32.xlu1 %v31_v10  ;;  %26 = vadd.xlane.f32.xlu0 %v25_v11  ;;  %v28_v13 = vsel %vm24_vm0, %v17_v7, 0.0  ;;  %v37_v19 = vsel %vm24_vm0, %v20_v15, 0.0  ;;  %v22_v21 = vmul.f32 %v237_v17, %v237_v17  ;;  %v46_v22 = vsel %vm24_vm0, %v23_v20, 0.0 }
   0x6   :  { %v40_v18 = vsel %vm24_vm0, %v21_v14, 0.0 }
   0x7   :  { %v43_v23 = vsel %vm24_vm0, %v22_v21, 0.0 }
   0x9   :  { %35 = vadd.xlane.f32.xlu1 %v34_v12  ;;  %29 = vadd.xlane.f32.xlu0 %v28_v13 }
   0xd   :  { %41 = vadd.xlane.f32.xlu1 %v40_v18  ;;  %38 = vadd.xlane.f32.xlu0 %v37_v19 }
  0x11   :  { %47 = vadd.xlane.f32.xlu1 %v46_v22  ;;  %44 = vadd.xlane.f32.xlu0 %v43_v23 }
  0x92   :  { %v33_v24 = vpop.xlane.xlu1 %32  ;;  %v27_v25 = vpop.xlane.xlu0 %26 }
  0x93   :  { %141 = vrsqrt.f32 %v33_v24  ;;  %vm65_vm1 = vcmp.eq.f32.partialorder %v33_v24, inf  ;;  %vm67_vm2 = vcmp.eq.f32.partialorder %v33_v24, 0.0  ;;  %v68_v35 = vand.u32 2147483648, %v33_v24 }
  0x94   :  { %143 = vrsqrt.f32 %v27_v25  ;;  %vm51_vm3 = vcmp.eq.f32.partialorder %v27_v25, inf  ;;  %v54_v38 = vand.u32 2147483648, %v27_v25  ;;  %vm53_vm4 = vcmp.eq.f32.partialorder %v27_v25, 0.0 }
  0x96   :  { %v36_v26 = vpop.xlane.xlu1 %35  ;;  %v30_v27 = vpop.xlane.xlu0 %29 }
  0x97   :  { %145 = vrsqrt.f32 %v36_v26  ;;  %vm72_vm5 = vcmp.eq.f32.partialorder %v36_v26, inf  ;;  %vm74_vm6 = vcmp.eq.f32.partialorder %v36_v26, 0.0  ;;  %v75_v47 = vand.u32 2147483648, %v36_v26 }
  0x98   :  { %147 = vrsqrt.f32 %v30_v27  ;;  %vm58_vm7 = vcmp.eq.f32.partialorder %v30_v27, inf  ;;  %v61_v50 = vand.u32 2147483648, %v30_v27  ;;  %vm60_vm8 = vcmp.eq.f32.partialorder %v30_v27, 0.0 }
  0x9a   :  { %v42_v28 = vpop.xlane.xlu1 %41  ;;  %v39_v29 = vpop.xlane.xlu0 %38 }
  0x9b   :  { %149 = vrsqrt.f32 %v42_v28  ;;  %vm86_vm9 = vcmp.eq.f32.partialorder %v42_v28, inf  ;;  %vm88_vm10 = vcmp.eq.f32.partialorder %v42_v28, 0.0  ;;  %v89_v59 = vand.u32 2147483648, %v42_v28 }
  0x9c   :  { %151 = vrsqrt.f32 %v39_v29  ;;  %vm79_vm11 = vcmp.eq.f32.partialorder %v39_v29, inf  ;;  %v82_v62 = vand.u32 2147483648, %v39_v29  ;;  %vm81_vm12 = vcmp.eq.f32.partialorder %v39_v29, 0.0 }
  0x9d   :  { %v142_v30 = vpop.eup %141 }
  0x9e   :  { %v144_v31 = vpop.eup %143  ;;  %v64_v32 = vmul.f32 %v142_v30, %v33_v24  ;;  %v247_v33 = vpop.xlane.xlu1 %47 }
  0x9f   :  { %v249_v34 = vpop.xlane.xlu0 %44  ;;  %v50_v36 = vmul.f32 %v144_v31, %v27_v25  ;;  %153 = vrsqrt.f32 %v247_v33  ;;  %vm100_vm13 = vcmp.eq.f32.partialorder %v247_v33, inf  ;;  %vm102_vm14 = vcmp.eq.f32.partialorder %v247_v33, 0.0 }
  0xa0   :  { %v66_v37 = vsel %vm65_vm1, %v33_v24, %v64_v32  ;;  %155 = vrsqrt.f32 %v249_v34  ;;  %v103_v13 = vand.u32 2147483648, %v247_v33  ;;  %vm93_vm15 = vcmp.eq.f32.partialorder %v249_v34, inf }
  0xa1   :  { %v146_v39 = vpop.eup %145  ;;  %v69_v40 = vsel %vm67_vm2, %v68_v35, %v66_v37  ;;  %v52_v41 = vsel %vm51_vm3, %v27_v25, %v50_v36  ;;  %v96_v18 = vand.u32 2147483648, %v249_v34  ;;  %vm95_vm1 = vcmp.eq.f32.partialorder %v249_v34, 0.0 }
  0xa2   :  { %v148_v42 = vpop.eup %147  ;;  %v107_v43 = vadd.f32 1e-12, %v69_v40  ;;  %v55_v44 = vsel %vm53_vm4, %v54_v38, %v52_v41  ;;  %v71_v45 = vmul.f32 %v146_v39, %v36_v26 }
  0xa3   :  { %v105_v46 = vadd.f32 1e-12, %v55_v44  ;;  %v57_v48 = vmul.f32 %v148_v42, %v30_v27 }
  0xa4   :  { %157 = vrcp.f32 %v107_v43  ;;  %v73_v49 = vsel %vm72_vm5, %v36_v26, %v71_v45 }
  0xa5   :  { %v150_v51 = vpop.eup %149  ;;  %159 = vrcp.f32 %v105_v46  ;;  %v76_v52 = vsel %vm74_vm6, %v75_v47, %v73_v49  ;;  %v59_v53 = vsel %vm58_vm7, %v30_v27, %v57_v48 }
  0xa6   :  { %v152_v54 = vpop.eup %151  ;;  %v108_v55 = vadd.f32 1e-12, %v76_v52  ;;  %v62_v56 = vsel %vm60_vm8, %v61_v50, %v59_v53  ;;  %v85_v57 = vmul.f32 %v150_v51, %v42_v28 }
  0xa7   :  { %v106_v58 = vadd.f32 1e-12, %v62_v56  ;;  %v78_v60 = vmul.f32 %v152_v54, %v39_v29 }
  0xa8   :  { %161 = vrcp.f32 %v108_v55  ;;  %v87_v61 = vsel %vm86_vm9, %v42_v28, %v85_v57 }
  0xa9   :  { %v154_v63 = vpop.eup %153  ;;  %163 = vrcp.f32 %v106_v58  ;;  %v90_v3 = vsel %vm88_vm10, %v89_v59, %v87_v61  ;;  %v80_v4 = vsel %vm79_vm11, %v39_v29, %v78_v60 }
  0xaa   :  { %v156_v5 = vpop.eup %155  ;;  %v110_v7 = vadd.f32 1e-12, %v90_v3  ;;  %v83_v10 = vsel %vm81_vm12, %v82_v62, %v80_v4  ;;  %v99_v11 = vmul.f32 %v154_v63, %v247_v33 }
  0xab   :  { %v109_v12 = vadd.f32 1e-12, %v83_v10  ;;  %v92_v14 = vmul.f32 %v156_v5, %v249_v34 }
  0xac   :  { %165 = vrcp.f32 %v110_v7  ;;  %v101_v15 = vsel %vm100_vm13, %v247_v33, %v99_v11 }
  0xad   :  { %167 = vrcp.f32 %v109_v12  ;;  %v104_v19 = vsel %vm102_vm14, %v103_v13, %v101_v15  ;;  %v94_v20 = vsel %vm93_vm15, %v249_v34, %v92_v14 }
  0xae   :  { %v158_v21 = vpop.eup %157  ;;  %v112_v22 = vadd.f32 1e-12, %v104_v19  ;;  %v97_v23 = vsel %vm95_vm1, %v96_v18, %v94_v20 }
  0xaf   :  { %v160_v24 = vpop.eup %159  ;;  %v118_v25 = vmul.f32 %v158_v21, %v186_v0  ;;  %v111_v26 = vadd.f32 1e-12, %v97_v23 }
  0xb0   :  { %v114_v27 = vmul.f32 %v160_v24, %v191_v1  ;;  %169 = vrcp.f32 %v112_v22 }
  0xb1   :  { %131 = vst.msk [vmem:[%s304_s1 + $0x10] sm:$0xff] %vm24_vm0, %v118_v25  ;;  %171 = vrcp.f32 %v111_v26 }
  0xb2   :  { %v162_v28 = vpop.eup %161  ;;  %129 = vst.msk [vmem:[%s304_s1] sm:$0xff] %vm24_vm0, %v114_v27 }
  0xb3   :  { %v164_v29 = vpop.eup %163  ;;  %v120_v30 = vmul.f32 %v162_v28, %v196_v2 }
  0xb4   :  { %v116_v0 = vmul.f32 %v164_v29, %v207_v6 }
  0xb5   :  { %132 = vst.msk [vmem:[%s304_s1 + $0x18] sm:$0xff] %vm24_vm0, %v120_v30 }
  0xb6   :  { %v166_v1 = vpop.eup %165  ;;  %130 = vst.msk [vmem:[%s304_s1 + $0x8] sm:$0xff] %vm24_vm0, %v116_v0 }
  0xb7   :  { %v168_v31 = vpop.eup %167  ;;  %v124_v32 = vmul.f32 %v166_v1, %v214_v8 }
  0xb8   :  { %v122_v33 = vmul.f32 %v168_v31, %v219_v9 }
  0xb9   :  { %134 = vst.msk [vmem:[%s304_s1 + $0x28] sm:$0xff] %vm24_vm0, %v124_v32 }
  0xba   :  { %v170_v2 = vpop.eup %169  ;;  %133 = vst.msk [vmem:[%s304_s1 + $0x20] sm:$0xff] %vm24_vm0, %v122_v33 }
  0xbb   :  { %v172_v6 = vpop.eup %171  ;;  %v128_v34 = vmul.f32 %v170_v2, %v232_v16 }
  0xbc   :  { %v126_v35 = vmul.f32 %v172_v6, %v237_v17 }
  0xbd   :  { %136 = vst.msk [vmem:[%s304_s1 + $0x38] sm:$0xff] %vm24_vm0, %v128_v34 }
  0xbe   :  { %135 = vst.msk [vmem:[%s304_s1 + $0x30] sm:$0xff] %vm24_vm0, %v126_v35 }

</bundles_post_ra>
